<compile_context>
chip_gen: v5e
topology: v5e:2x2
jax: 0.10.0
libtpu: 0.0.40
codegen_flags: <defaults>
</compile_context>

<pallas_src>
import functools

import jax
import jax.numpy as jnp
from jax import lax
from jax.experimental import pallas as pl
from jax.experimental.pallas import tpu as pltpu


_HALF_LOG_2PI = 0.9189385332046727  # 0.5 * log(2*pi)


# ----------------------------------------------------------------------------
# lgamma for z > 0 via a fixed shift of 4 + Stirling series:
#   lgamma(z) = lgamma(z+4) - log(z (z+1)(z+2)(z+3))
#   lgamma(w) ~ (w-0.5) log w - w + 0.5 log 2pi + 1/(12w) - 1/(360 w^3) + 1/(1260 w^5)
# Truncation error <= 1/(1680 w^7) < 4e-8 for w >= 4.  EUP cost: 2 logs + 1
# approx reciprocal (the reciprocal only feeds the ~0.02-magnitude correction,
# so approx precision is more than enough).
# ----------------------------------------------------------------------------
def _lgamma_pos(z):
    w = z + 4.0
    logw = jnp.log(w)
    rw = pl.reciprocal(w, approx=True)
    rw2 = rw * rw
    corr = rw * (1.0 / 12.0 - rw2 * (1.0 / 360.0 - rw2 * (1.0 / 1260.0)))
    p = (z * (z + 1.0)) * ((z + 2.0) * (z + 3.0))
    return (w - 0.5) * logw - w + _HALF_LOG_2PI + corr - jnp.log(p)


# ----------------------------------------------------------------------------
# Pallas kernel: one grid axis over row blocks ("parallel" -- no carried
# state).  Each block writes a single already-weighted partial-loss scalar
# into lane 0 of a lane-dense (8,128) output block; the remaining lanes are
# zero so the host-side reduction is just jnp.sum over the whole output.
# ----------------------------------------------------------------------------
def _zinb_kernel(preds_ref, theta_ref, pi_ref, truth_ref, enc_ref, out_ref, *,
                 eps, scale_factor, ridge_lambda, tv_lambda, l1_lambda, inv_n):
    y_true = truth_ref[...].astype(jnp.float32)
    y_pred = preds_ref[...].astype(jnp.float32) * scale_factor
    theta = jnp.minimum(theta_ref[...].astype(jnp.float32), 1e6)   # clamp(max=1e6)
    pi = pi_ref[...].astype(jnp.float32)

    te = theta + eps
    l_theta = jnp.log(te)                     # L1 = log(theta+eps)
    l_mu_th = jnp.log(theta + y_pred + eps)   # L2 = log(theta+y_pred+eps)
    l_mu = jnp.log(y_pred + eps)              # L3 = log(y_pred+eps)

    # negative binomial NLL (elementwise, no mean)
    t1 = (_lgamma_pos(te)
          + _lgamma_pos(y_true + 1.0)
          - _lgamma_pos(y_true + te))
    # log1p(y_pred/(theta+eps)) == L2 - L1 (mathematically identical)
    t2 = (theta + y_true) * (l_mu_th - l_theta) + y_true * (l_theta - l_mu)
    nb_case = t1 + t2 - jnp.log(1.0 - pi + eps)

    # pow(theta/(theta+y_pred+eps), theta) == exp(theta*(log(theta) - L2));
    # using L1 instead of log(theta) differs by O(eps).
    zero_nb = jnp.exp(theta * (l_theta - l_mu_th))
    zero_case = -jnp.log(pi + (1.0 - pi) * zero_nb + eps)

    result = jnp.where(y_true < 1e-8, zero_case, nb_case)
    result = result + ridge_lambda * (pi * pi)

    # Per-block partial sums (XLU reductions; free next to the EUP bottleneck).
    s_main = jnp.sum(result)
    # total variation along the last axis (full columns live in this block)
    s_tv = jnp.sum(jnp.abs(pi[:, 1:] - pi[:, :-1]))
    s_enc = jnp.sum(jnp.abs(enc_ref[...].astype(jnp.float32)))

    # mean(result + tv_lambda*tv) == mean(result) + tv_lambda*tv (tv is scalar)
    partial = inv_n * s_main + tv_lambda * s_tv + l1_lambda * s_enc

    r = lax.broadcasted_iota(jnp.int32, out_ref.shape, 0)
    c = lax.broadcasted_iota(jnp.int32, out_ref.shape, 1)
    out_ref[...] = jnp.where((r == 0) & (c == 0), partial, 0.0)


def _pick_block_rows(B, G, H, budget_bytes=24 * 1024 * 1024):
    """Largest row-block whose double-buffered input tiles fit the VMEM budget."""
    per_row_bytes = (4 * G + H) * 4          # 4 gene-wide f32 streams + latent
    cap = max(1, budget_bytes // (2 * per_row_bytes))
    if B <= cap:
        return B
    best_mult8, best_any = 0, 1
    i = 1
    while i * i <= B:
        if B % i == 0:
            for d in (i, B // i):
                if d <= cap:
                    if d % 8 == 0 and d > best_mult8:
                        best_mult8 = d
                    if d > best_any:
                        best_any = d
        i += 1
    return best_mult8 if best_mult8 else best_any


def zinb_loss_pallas(preds, theta, pi, truth, encoded, *,
                     ridge_lambda=0.0, tv_lambda=0.0, l1_lambda=0.0,
                     eps=1e-10, scale_factor=1.0, block_rows=None):
    B, G = preds.shape
    Be, H = encoded.shape
    assert Be == B, (Be, B)
    if block_rows is None:
        block_rows = _pick_block_rows(B, G, H)
    assert B % block_rows == 0, (B, block_rows)
    nblocks = B // block_rows

    kernel = functools.partial(
        _zinb_kernel,
        eps=eps, scale_factor=scale_factor,
        ridge_lambda=ridge_lambda, tv_lambda=tv_lambda, l1_lambda=l1_lambda,
        inv_n=1.0 / float(B * G))

    row_spec = pl.BlockSpec((block_rows, G), lambda i: (i, 0))
    enc_spec = pl.BlockSpec((block_rows, H), lambda i: (i, 0))
    out_spec = pl.BlockSpec((8, 128), lambda i: (i, 0))

    partials = pl.pallas_call(
        kernel,
        out_shape=jax.ShapeDtypeStruct((8 * nblocks, 128), jnp.float32),
        grid_spec=pltpu.PrefetchScalarGridSpec(
            num_scalar_prefetch=0,
            grid=(nblocks,),
            in_specs=[row_spec, row_spec, row_spec, row_spec, enc_spec],
            out_specs=out_spec),
        compiler_params=pltpu.CompilerParams(
            dimension_semantics=("parallel",),      # independent blocks -> both TCs on v7x
            vmem_limit_bytes=48 * 1024 * 1024),
    )(preds, theta, pi, truth, encoded)

    # Tiny final reduction (nblocks scalars padded into lane-dense blocks).
    return jnp.sum(partials)


# ----------------------------------------------------------------------------
# Pure-JAX reference (mirrors the PyTorch forward exactly).
# ----------------------------------------------------------------------------
def zinb_loss_ref(preds, theta_disp, pi, truth, encoded, *,
                  ridge_lambda, tv_lambda, l1_lambda, eps=1e-10, scale_factor=1.0):
    y_true = truth
    y_pred = preds * scale_factor
    theta = jnp.minimum(theta_disp, 1e6)
    t1 = (lax.lgamma(theta + eps) + lax.lgamma(y_true + 1.0)
          - lax.lgamma(y_true + theta + eps))
    t2 = ((theta + y_true) * jnp.log1p(y_pred / (theta + eps))
          + y_true * (jnp.log(theta + eps) - jnp.log(y_pred + eps)))
    nb = t1 + t2
    nb_case = nb - jnp.log(1.0 - pi + eps)
    zero_nb = jnp.power(theta / (theta + y_pred + eps), theta)
    zero_case = -jnp.log(pi + (1.0 - pi) * zero_nb + eps)
    result = jnp.where(y_true < 1e-8, zero_case, nb_case)
    result = result + ridge_lambda * pi ** 2
    tv = jnp.sum(jnp.abs(pi[:, :-1] - pi[:, 1:]))
    result = result + tv_lambda * tv
    loss = jnp.mean(result)
    return loss + l1_lambda * jnp.sum(jnp.abs(encoded))


if __name__ == "__main__":
    # Small, deterministic example shapes: 16 cells x 32 genes, 64-d latent.
    B, G, H = 16, 32, 64
    key = jax.random.PRNGKey(0)
    k1, k2, k3, k4, k5 = jax.random.split(key, 5)

    preds = jnp.exp(0.5 * jax.random.normal(k1, (B, G), jnp.float32))          # NB means > 0
    theta = jax.nn.softplus(jax.random.normal(k2, (B, G), jnp.float32)) + 0.1  # dispersion > 0
    pi = jax.nn.sigmoid(jax.random.normal(k3, (B, G), jnp.float32))            # dropout in (0,1)
    truth = jax.random.poisson(k4, 2.0, (B, G)).astype(jnp.float32)            # counts (incl. zeros)
    encoded = jax.random.normal(k5, (B, H), jnp.float32)                       # latent for L1 term

    # Non-zero regularizers to exercise the full forward path
    # (module defaults are 0.0; these are plain constructor hyperparameters).
    hp = dict(ridge_lambda=0.1, tv_lambda=0.01, l1_lambda=0.001)

    out = zinb_loss_pallas(preds, theta, pi, truth, encoded, **hp)
    out = jax.block_until_ready(out)

    ref = zinb_loss_ref(preds, theta, pi, truth, encoded, **hp)
    ref = jax.block_until_ready(ref)

    assert jnp.isfinite(out), out
    assert abs(float(out) - float(ref)) <= 2e-3 * max(1.0, abs(float(ref))), (out, ref)
    # TODO(synk): debug asserts and TensorBoard histograms from the PyTorch
    # module are no-ops for the forward value and are intentionally omitted.
    print("KERNEL_OK")
</pallas_src>

<mosaic_0001>
module attributes {stable_mosaic.version = 11 : i64} {
  func.func @_zinb_kernel(%arg0: i32, %arg1: memref<16x32xf32, #tpu.memory_space<vmem>>, %arg2: memref<16x32xf32, #tpu.memory_space<vmem>>, %arg3: memref<16x32xf32, #tpu.memory_space<vmem>>, %arg4: memref<16x32xf32, #tpu.memory_space<vmem>>, %arg5: memref<16x64xf32, #tpu.memory_space<vmem>>, %arg6: memref<8x128xf32, #tpu.memory_space<vmem>>) attributes {dimension_semantics = [#tpu.dimension_semantics<parallel>], iteration_bounds = array<i64: 1>, scalar_prefetch = 0 : i64, scratch_operands = 0 : i64, tpu.core_type = #tpu.core_type<tc>, window_params = [{transform_indices = @transform_0, window_bounds = array<i64: 16, 32>}, {transform_indices = @transform_1, window_bounds = array<i64: 16, 32>}, {transform_indices = @transform_2, window_bounds = array<i64: 16, 32>}, {transform_indices = @transform_3, window_bounds = array<i64: 16, 32>}, {transform_indices = @transform_4, window_bounds = array<i64: 16, 64>}, {transform_indices = @transform_5, window_bounds = array<i64: 8, 128>}]} {
    %c0 = arith.constant 0 : index
    %c0_0 = arith.constant 0 : index
    %0 = vector.load %arg4[%c0, %c0_0] : memref<16x32xf32, #tpu.memory_space<vmem>>, vector<16x32xf32>
    %c0_1 = arith.constant 0 : index
    %c0_2 = arith.constant 0 : index
    %1 = vector.load %arg1[%c0_1, %c0_2] : memref<16x32xf32, #tpu.memory_space<vmem>>, vector<16x32xf32>
    %cst = arith.constant 1.000000e+00 : f32
    %2 = vector.broadcast %cst : f32 to vector<16x32xf32>
    %3 = arith.mulf %1, %2 : vector<16x32xf32>
    %c0_3 = arith.constant 0 : index
    %c0_4 = arith.constant 0 : index
    %4 = vector.load %arg2[%c0_3, %c0_4] : memref<16x32xf32, #tpu.memory_space<vmem>>, vector<16x32xf32>
    %cst_5 = arith.constant 1.000000e+06 : f32
    %5 = vector.broadcast %cst_5 : f32 to vector<16x32xf32>
    %6 = arith.minimumf %4, %5 : vector<16x32xf32>
    %c0_6 = arith.constant 0 : index
    %c0_7 = arith.constant 0 : index
    %7 = vector.load %arg3[%c0_6, %c0_7] : memref<16x32xf32, #tpu.memory_space<vmem>>, vector<16x32xf32>
    %cst_8 = arith.constant 1.000000e-10 : f32
    %8 = vector.broadcast %cst_8 : f32 to vector<16x32xf32>
    %9 = arith.addf %6, %8 : vector<16x32xf32>
    %10 = math.log %9 : vector<16x32xf32>
    %11 = arith.addf %6, %3 : vector<16x32xf32>
    %cst_9 = arith.constant 1.000000e-10 : f32
    %12 = vector.broadcast %cst_9 : f32 to vector<16x32xf32>
    %13 = arith.addf %11, %12 : vector<16x32xf32>
    %14 = math.log %13 : vector<16x32xf32>
    %cst_10 = arith.constant 1.000000e-10 : f32
    %15 = vector.broadcast %cst_10 : f32 to vector<16x32xf32>
    %16 = arith.addf %3, %15 : vector<16x32xf32>
    %17 = math.log %16 : vector<16x32xf32>
    %cst_11 = arith.constant 4.000000e+00 : f32
    %18 = vector.broadcast %cst_11 : f32 to vector<16x32xf32>
    %19 = arith.addf %9, %18 : vector<16x32xf32>
    %20 = math.log %19 : vector<16x32xf32>
    %21 = tpu.reciprocal %19 {approx = true} : vector<16x32xf32> -> vector<16x32xf32>
    %22 = arith.mulf %21, %21 : vector<16x32xf32>
    %cst_12 = arith.constant 7.93650805E-4 : f32
    %23 = vector.broadcast %cst_12 : f32 to vector<16x32xf32>
    %24 = arith.mulf %22, %23 : vector<16x32xf32>
    %cst_13 = arith.constant 0.00277777785 : f32
    %25 = vector.broadcast %cst_13 : f32 to vector<16x32xf32>
    %26 = arith.subf %25, %24 : vector<16x32xf32>
    %27 = arith.mulf %22, %26 : vector<16x32xf32>
    %cst_14 = arith.constant 0.0833333358 : f32
    %28 = vector.broadcast %cst_14 : f32 to vector<16x32xf32>
    %29 = arith.subf %28, %27 : vector<16x32xf32>
    %30 = arith.mulf %21, %29 : vector<16x32xf32>
    %cst_15 = arith.constant 1.000000e+00 : f32
    %31 = vector.broadcast %cst_15 : f32 to vector<16x32xf32>
    %32 = arith.addf %9, %31 : vector<16x32xf32>
    %33 = arith.mulf %9, %32 : vector<16x32xf32>
    %cst_16 = arith.constant 2.000000e+00 : f32
    %34 = vector.broadcast %cst_16 : f32 to vector<16x32xf32>
    %35 = arith.addf %9, %34 : vector<16x32xf32>
    %cst_17 = arith.constant 3.000000e+00 : f32
    %36 = vector.broadcast %cst_17 : f32 to vector<16x32xf32>
    %37 = arith.addf %9, %36 : vector<16x32xf32>
    %38 = arith.mulf %35, %37 : vector<16x32xf32>
    %39 = arith.mulf %33, %38 : vector<16x32xf32>
    %cst_18 = arith.constant 5.000000e-01 : f32
    %40 = vector.broadcast %cst_18 : f32 to vector<16x32xf32>
    %41 = arith.subf %19, %40 : vector<16x32xf32>
    %42 = arith.mulf %41, %20 : vector<16x32xf32>
    %43 = arith.subf %42, %19 : vector<16x32xf32>
    %cst_19 = arith.constant 0.918938517 : f32
    %44 = vector.broadcast %cst_19 : f32 to vector<16x32xf32>
    %45 = arith.addf %43, %44 : vector<16x32xf32>
    %46 = arith.addf %45, %30 : vector<16x32xf32>
    %47 = math.log %39 : vector<16x32xf32>
    %48 = arith.subf %46, %47 : vector<16x32xf32>
    %cst_20 = arith.constant 1.000000e+00 : f32
    %49 = vector.broadcast %cst_20 : f32 to vector<16x32xf32>
    %50 = arith.addf %0, %49 : vector<16x32xf32>
    %cst_21 = arith.constant 4.000000e+00 : f32
    %51 = vector.broadcast %cst_21 : f32 to vector<16x32xf32>
    %52 = arith.addf %50, %51 : vector<16x32xf32>
    %53 = math.log %52 : vector<16x32xf32>
    %54 = tpu.reciprocal %52 {approx = true} : vector<16x32xf32> -> vector<16x32xf32>
    %55 = arith.mulf %54, %54 : vector<16x32xf32>
    %cst_22 = arith.constant 7.93650805E-4 : f32
    %56 = vector.broadcast %cst_22 : f32 to vector<16x32xf32>
    %57 = arith.mulf %55, %56 : vector<16x32xf32>
    %cst_23 = arith.constant 0.00277777785 : f32
    %58 = vector.broadcast %cst_23 : f32 to vector<16x32xf32>
    %59 = arith.subf %58, %57 : vector<16x32xf32>
    %60 = arith.mulf %55, %59 : vector<16x32xf32>
    %cst_24 = arith.constant 0.0833333358 : f32
    %61 = vector.broadcast %cst_24 : f32 to vector<16x32xf32>
    %62 = arith.subf %61, %60 : vector<16x32xf32>
    %63 = arith.mulf %54, %62 : vector<16x32xf32>
    %cst_25 = arith.constant 1.000000e+00 : f32
    %64 = vector.broadcast %cst_25 : f32 to vector<16x32xf32>
    %65 = arith.addf %50, %64 : vector<16x32xf32>
    %66 = arith.mulf %50, %65 : vector<16x32xf32>
    %cst_26 = arith.constant 2.000000e+00 : f32
    %67 = vector.broadcast %cst_26 : f32 to vector<16x32xf32>
    %68 = arith.addf %50, %67 : vector<16x32xf32>
    %cst_27 = arith.constant 3.000000e+00 : f32
    %69 = vector.broadcast %cst_27 : f32 to vector<16x32xf32>
    %70 = arith.addf %50, %69 : vector<16x32xf32>
    %71 = arith.mulf %68, %70 : vector<16x32xf32>
    %72 = arith.mulf %66, %71 : vector<16x32xf32>
    %cst_28 = arith.constant 5.000000e-01 : f32
    %73 = vector.broadcast %cst_28 : f32 to vector<16x32xf32>
    %74 = arith.subf %52, %73 : vector<16x32xf32>
    %75 = arith.mulf %74, %53 : vector<16x32xf32>
    %76 = arith.subf %75, %52 : vector<16x32xf32>
    %cst_29 = arith.constant 0.918938517 : f32
    %77 = vector.broadcast %cst_29 : f32 to vector<16x32xf32>
    %78 = arith.addf %76, %77 : vector<16x32xf32>
    %79 = arith.addf %78, %63 : vector<16x32xf32>
    %80 = math.log %72 : vector<16x32xf32>
    %81 = arith.subf %79, %80 : vector<16x32xf32>
    %82 = arith.addf %48, %81 : vector<16x32xf32>
    %83 = arith.addf %0, %9 : vector<16x32xf32>
    %cst_30 = arith.constant 4.000000e+00 : f32
    %84 = vector.broadcast %cst_30 : f32 to vector<16x32xf32>
    %85 = arith.addf %83, %84 : vector<16x32xf32>
    %86 = math.log %85 : vector<16x32xf32>
    %87 = tpu.reciprocal %85 {approx = true} : vector<16x32xf32> -> vector<16x32xf32>
    %88 = arith.mulf %87, %87 : vector<16x32xf32>
    %cst_31 = arith.constant 7.93650805E-4 : f32
    %89 = vector.broadcast %cst_31 : f32 to vector<16x32xf32>
    %90 = arith.mulf %88, %89 : vector<16x32xf32>
    %cst_32 = arith.constant 0.00277777785 : f32
    %91 = vector.broadcast %cst_32 : f32 to vector<16x32xf32>
    %92 = arith.subf %91, %90 : vector<16x32xf32>
    %93 = arith.mulf %88, %92 : vector<16x32xf32>
    %cst_33 = arith.constant 0.0833333358 : f32
    %94 = vector.broadcast %cst_33 : f32 to vector<16x32xf32>
    %95 = arith.subf %94, %93 : vector<16x32xf32>
    %96 = arith.mulf %87, %95 : vector<16x32xf32>
    %cst_34 = arith.constant 1.000000e+00 : f32
    %97 = vector.broadcast %cst_34 : f32 to vector<16x32xf32>
    %98 = arith.addf %83, %97 : vector<16x32xf32>
    %99 = arith.mulf %83, %98 : vector<16x32xf32>
    %cst_35 = arith.constant 2.000000e+00 : f32
    %100 = vector.broadcast %cst_35 : f32 to vector<16x32xf32>
    %101 = arith.addf %83, %100 : vector<16x32xf32>
    %cst_36 = arith.constant 3.000000e+00 : f32
    %102 = vector.broadcast %cst_36 : f32 to vector<16x32xf32>
    %103 = arith.addf %83, %102 : vector<16x32xf32>
    %104 = arith.mulf %101, %103 : vector<16x32xf32>
    %105 = arith.mulf %99, %104 : vector<16x32xf32>
    %cst_37 = arith.constant 5.000000e-01 : f32
    %106 = vector.broadcast %cst_37 : f32 to vector<16x32xf32>
    %107 = arith.subf %85, %106 : vector<16x32xf32>
    %108 = arith.mulf %107, %86 : vector<16x32xf32>
    %109 = arith.subf %108, %85 : vector<16x32xf32>
    %cst_38 = arith.constant 0.918938517 : f32
    %110 = vector.broadcast %cst_38 : f32 to vector<16x32xf32>
    %111 = arith.addf %109, %110 : vector<16x32xf32>
    %112 = arith.addf %111, %96 : vector<16x32xf32>
    %113 = math.log %105 : vector<16x32xf32>
    %114 = arith.subf %112, %113 : vector<16x32xf32>
    %115 = arith.subf %82, %114 : vector<16x32xf32>
    %116 = arith.addf %6, %0 : vector<16x32xf32>
    %117 = arith.subf %14, %10 : vector<16x32xf32>
    %118 = arith.mulf %116, %117 : vector<16x32xf32>
    %119 = arith.subf %10, %17 : vector<16x32xf32>
    %120 = arith.mulf %0, %119 : vector<16x32xf32>
    %121 = arith.addf %118, %120 : vector<16x32xf32>
    %122 = arith.addf %115, %121 : vector<16x32xf32>
    %cst_39 = arith.constant 1.000000e+00 : f32
    %123 = vector.broadcast %cst_39 : f32 to vector<16x32xf32>
    %124 = arith.subf %123, %7 : vector<16x32xf32>
    %cst_40 = arith.constant 1.000000e-10 : f32
    %125 = vector.broadcast %cst_40 : f32 to vector<16x32xf32>
    %126 = arith.addf %124, %125 : vector<16x32xf32>
    %127 = math.log %126 : vector<16x32xf32>
    %128 = arith.subf %122, %127 : vector<16x32xf32>
    %129 = arith.subf %10, %14 : vector<16x32xf32>
    %130 = arith.mulf %6, %129 : vector<16x32xf32>
    %131 = math.exp %130 : vector<16x32xf32>
    %cst_41 = arith.constant 1.000000e+00 : f32
    %132 = vector.broadcast %cst_41 : f32 to vector<16x32xf32>
    %133 = arith.subf %132, %7 : vector<16x32xf32>
    %134 = arith.mulf %133, %131 : vector<16x32xf32>
    %135 = arith.addf %7, %134 : vector<16x32xf32>
    %cst_42 = arith.constant 1.000000e-10 : f32
    %136 = vector.broadcast %cst_42 : f32 to vector<16x32xf32>
    %137 = arith.addf %135, %136 : vector<16x32xf32>
    %138 = math.log %137 : vector<16x32xf32>
    %cst_43 = arith.constant 0.000000e+00 : f32
    %139 = vector.broadcast %cst_43 : f32 to vector<16x32xf32>
    %140 = arith.subf %139, %138 : vector<16x32xf32>
    %cst_44 = arith.constant 9.99999993E-9 : f32
    %141 = vector.broadcast %cst_44 : f32 to vector<16x32xf32>
    %142 = arith.cmpf olt, %0, %141 : vector<16x32xf32>
    %143 = arith.select %142, %140, %128 : vector<16x32xi1>, vector<16x32xf32>
    %144 = arith.mulf %7, %7 : vector<16x32xf32>
    %cst_45 = arith.constant 1.000000e-01 : f32
    %145 = vector.broadcast %cst_45 : f32 to vector<16x32xf32>
    %146 = arith.mulf %145, %144 : vector<16x32xf32>
    %147 = arith.addf %143, %146 : vector<16x32xf32>
    %148 = vector.shape_cast %147 : vector<16x32xf32> to vector<1x16x32xf32>
    %cst_46 = arith.constant dense<0.000000e+00> : vector<1xf32>
    %149 = vector.multi_reduction <add>, %148, %cst_46 [1, 2] : vector<1x16x32xf32> to vector<1xf32>
    %150 = vector.shape_cast %149 : vector<1xf32> to vector<1x1x1xf32>
    %151 = vector.extract %150[0, 0, 0] : f32 from vector<1x1x1xf32>
    %152 = vector.extract_strided_slice %7 {offsets = [0, 1], sizes = [16, 31], strides = [1, 1]} : vector<16x32xf32> to vector<16x31xf32>
    %153 = vector.extract_strided_slice %7 {offsets = [0, 0], sizes = [16, 31], strides = [1, 1]} : vector<16x32xf32> to vector<16x31xf32>
    %154 = arith.subf %152, %153 : vector<16x31xf32>
    %155 = math.absf %154 : vector<16x31xf32>
    %156 = vector.shape_cast %155 : vector<16x31xf32> to vector<1x16x31xf32>
    %cst_47 = arith.constant dense<0.000000e+00> : vector<1xf32>
    %157 = vector.multi_reduction <add>, %156, %cst_47 [1, 2] : vector<1x16x31xf32> to vector<1xf32>
    %158 = vector.shape_cast %157 : vector<1xf32> to vector<1x1x1xf32>
    %159 = vector.extract %158[0, 0, 0] : f32 from vector<1x1x1xf32>
    %c0_48 = arith.constant 0 : index
    %c0_49 = arith.constant 0 : index
    %160 = vector.load %arg5[%c0_48, %c0_49] : memref<16x64xf32, #tpu.memory_space<vmem>>, vector<16x64xf32>
    %161 = math.absf %160 : vector<16x64xf32>
    %162 = vector.shape_cast %161 : vector<16x64xf32> to vector<1x16x64xf32>
    %cst_50 = arith.constant dense<0.000000e+00> : vector<1xf32>
    %163 = vector.multi_reduction <add>, %162, %cst_50 [1, 2] : vector<1x16x64xf32> to vector<1xf32>
    %164 = vector.shape_cast %163 : vector<1xf32> to vector<1x1x1xf32>
    %165 = vector.extract %164[0, 0, 0] : f32 from vector<1x1x1xf32>
    %cst_51 = arith.constant 0.001953125 : f32
    %166 = arith.mulf %cst_51, %151 : f32
    %cst_52 = arith.constant 0.00999999977 : f32
    %167 = arith.mulf %cst_52, %159 : f32
    %168 = arith.addf %166, %167 : f32
    %cst_53 = arith.constant 1.000000e-03 : f32
    %169 = arith.mulf %cst_53, %165 : f32
    %170 = arith.addf %168, %169 : f32
    %171 = tpu.iota {dimensions = array<i32: 0>} : vector<8x128xi32>
    %172 = tpu.iota {dimensions = array<i32: 1>} : vector<8x128xi32>
    %c0_i32 = arith.constant 0 : i32
    %173 = vector.broadcast %c0_i32 : i32 to vector<8x128xi32>
    %174 = arith.cmpi eq, %171, %173 : vector<8x128xi32>
    %c0_i32_54 = arith.constant 0 : i32
    %175 = vector.broadcast %c0_i32_54 : i32 to vector<8x128xi32>
    %176 = arith.cmpi eq, %172, %175 : vector<8x128xi32>
    %177 = arith.andi %174, %176 : vector<8x128xi1>
    %cst_55 = arith.constant 0.000000e+00 : f32
    %178 = vector.broadcast %170 : f32 to vector<8x128xf32>
    %179 = vector.broadcast %cst_55 : f32 to vector<8x128xf32>
    %180 = arith.select %177, %178, %179 : vector<8x128xi1>, vector<8x128xf32>
    %c0_56 = arith.constant 0 : index
    %c0_57 = arith.constant 0 : index
    %181 = vector.load %arg6[%c0_56, %c0_57] : memref<8x128xf32, #tpu.memory_space<vmem>>, vector<8x128xf32>
    tpu.vector_store %arg6[%c0_56, %c0_57], %180 {strides = array<i32>} : memref<8x128xf32, #tpu.memory_space<vmem>>, vector<8x128xf32>,
    return
  }
  func.func @transform_0(%arg0: i32) -> (i32, i32) {
    %c0_i32 = arith.constant 0 : i32
    %c0_i32_0 = arith.constant 0 : i32
    return %arg0, %c0_i32 : i32, i32
  }
  func.func @transform_1(%arg0: i32) -> (i32, i32) {
    %c0_i32 = arith.constant 0 : i32
    %c0_i32_0 = arith.constant 0 : i32
    return %arg0, %c0_i32 : i32, i32
  }
  func.func @transform_2(%arg0: i32) -> (i32, i32) {
    %c0_i32 = arith.constant 0 : i32
    %c0_i32_0 = arith.constant 0 : i32
    return %arg0, %c0_i32 : i32, i32
  }
  func.func @transform_3(%arg0: i32) -> (i32, i32) {
    %c0_i32 = arith.constant 0 : i32
    %c0_i32_0 = arith.constant 0 : i32
    return %arg0, %c0_i32 : i32, i32
  }
  func.func @transform_4(%arg0: i32) -> (i32, i32) {
    %c0_i32 = arith.constant 0 : i32
    %c0_i32_0 = arith.constant 0 : i32
    return %arg0, %c0_i32 : i32, i32
  }
  func.func @transform_5(%arg0: i32) -> (i32, i32) {
    %c0_i32 = arith.constant 0 : i32
    %c0_i32_0 = arith.constant 0 : i32
    return %arg0, %c0_i32 : i32, i32
  }
}

</mosaic_0001>

<bundles_post_ra>
// kernel: tpu_custom_call.1
= control target key start
LH: loop header
LB: loop body
LE: loop exit
PB: predicated region body
PF: predicated region fallthrough
CT: control target
= control target key end

     0   :  { %10 = vsyncpa [#allocation3], 0  ;;  %s900_s0 = inlined_call_operand.hbm [shape: f32[16,32], index: 0, kind: input, shape index: {}]   ;;  %s901_s1 = inlined_call_operand.hbm [shape: f32[16,32], index: 1, kind: input, shape index: {}]   ;;  %s902_s2 = inlined_call_operand.hbm [shape: f32[16,32], index: 2, kind: input, shape index: {}]   ;;  %s903_s3 = inlined_call_operand.hbm [shape: f32[16,32], index: 3, kind: input, shape index: {}]   ;;  %s904_s4 = inlined_call_operand.hbm [shape: f32[16,64], index: 4, kind: input, shape index: {}]   ;;  %s905_s5 = inlined_call_operand.hbm [shape: f32[8,128], index: 5, kind: output, shape index: {}]  }
   0x1   :  { %11 = vsyncpa [#allocation6], 0 }
   0x2   :  { %12 = vsyncpa [#allocation9], 0 }
   0x3   :  { %13 = vsyncpa [#allocation4], 0  ;;  %s31_s20 = sshll.u32 %s901_s1, 4  ;;  %s666_s21 = smov [#allocation5]   ;;  %s32_s20 = int_to_ptr.hbm [resolvable:$true] %s31_s20 }
   0x4   :  { %s33_s22 = sshll.u32 %s666_s21, 4  ;;  %s57_s25 = sshll.u32 %s903_s3, 4  ;;  %s34_s22 = int_to_ptr.vmem [resolvable:$true] %s33_s22  ;;  %s58_s25 = int_to_ptr.hbm [resolvable:$true] %s57_s25 }
   0x5   :  { %s667_s26 = smov 128   ;;  %s668_s27 = smov 8  }
   0x6   :  { %39 = dma.hbm_to_vmem [thread:$0]  %s32_s20, 256, %s34_s22, [#allocation6], %s667_s26, %s667_s26, %s668_s27  }
   0x7   :  { %s669_s28 = smov [#allocation8]   ;;  %s18_s7 = sshll.u32 %s900_s0, 4  ;;  %s19_s7 = int_to_ptr.hbm [resolvable:$true] %s18_s7 }
   0x8   :  { %s59_s29 = sshll.u32 %s669_s28, 4  ;;  %s44_s9 = sshll.u32 %s902_s2, 4  ;;  %s60_s29 = int_to_ptr.vmem [resolvable:$true] %s59_s29  ;;  %s45_s9 = int_to_ptr.hbm [resolvable:$true] %s44_s9 }
   0x9   :  { %65 = dma.hbm_to_vmem [thread:$0]  %s58_s25, 256, %s60_s29, [#allocation9], %s667_s26, %s667_s26, %s668_s27  }
   0xa   :  { %s670_s10 = smov [#allocation2]   ;;  %s671_s3 = smov [#allocation7]  }
   0xb   :  { %s20_s11 = sshll.u32 %s670_s10, 4  ;;  %s46_s12 = sshll.u32 %s671_s3, 4  ;;  %s21_s11 = int_to_ptr.vmem [resolvable:$true] %s20_s11  ;;  %s47_s12 = int_to_ptr.vmem [resolvable:$true] %s46_s12 }
   0xc   :  { %26 = dma.hbm_to_vmem [thread:$0]  %s19_s7, 256, %s21_s11, [#allocation3], %s667_s26, %s667_s26, %s668_s27  }
   0xd   :  { %s70_s15 = sshll.u32 %s904_s4, 4  ;;  %s672_s0 = smov [#allocation10]   ;;  %s71_s15 = int_to_ptr.hbm [resolvable:$true] %s70_s15 }
   0xe   :  { %52 = dma.hbm_to_vmem [thread:$0]  %s45_s9, 256, %s47_s12, [#allocation6], %s667_s26, %s667_s26, %s668_s27  }
   0xf   :  { %s72_s16 = sshll.u32 %s672_s0, 4  ;;  %s73_s16 = int_to_ptr.vmem [resolvable:$true] %s72_s16 }
  0x10   :  { %78 = dma.hbm_to_vmem [thread:$0]  %s71_s15, 256, %s73_s16, [#allocation9], %s667_s26, %s667_s26, %s668_s27  }
  0x11   :  { %658 = dma.done.wait [#allocation3], 256  }
  0x12   :  { %659 = vsyncadd [#allocation3], 4294967040 }
  0x13   :  { %660 = dma.done.wait [#allocation6], 512  }
  0x14   :  { %661 = vsyncadd [#allocation6], 4294966784 }
  0x15   :  { %662 = dma.done.wait [#allocation9], 512  }
  0x16   :  { %663 = vsyncadd [#allocation9], 4294966784  ;;  %v721_v0 = vld [vmem:[#allocation7] sm:$0xff]  ;;  %s673_s2 = smov 1   ;;  %v724_v1 = vld [vmem:[#allocation7 + $0x8] sm:$0xff]  ;;  %s674_s4 = smov 127  }
  0x17   :  { %350 = vrot.lane.b32.xlu0 %v721_v0, %s673_s2  ;;  %v103_v2 = vld [vmem:[#allocation5] sm:$0xff]  ;;  %v101_v3 = vld [vmem:[#allocation2] sm:$0xff]  ;;  %v104_v5 = vld [vmem:[#allocation5 + $0x8] sm:$0xff]  ;;  %vm335_vm2 = vcmask 261120   ;;  %vm385_vm3 = vcmask 523264   ;;  %vm368_vm4 = vcmask 252928  }
  0x18   :  { %v727_v4 = vmin.f32 %v103_v2, 1000000.0  ;;  %v730_v7 = vld [vmem:[#allocation8] sm:$0xff]  ;;  %v732_v8 = vmin.f32 %v104_v5, 1000000.0  ;;  %v734_v10 = vld [vmem:[#allocation8 + $0x8] sm:$0xff] }
  0x19   :  { %v123_v9 = vadd.f32 1e-10, %v101_v3  ;;  %v177_v14 = vadd.f32 1.0, %v730_v7  ;;  %v102_v15 = vld [vmem:[#allocation2 + $0x8] sm:$0xff]  ;;  %v742_v16 = vadd.f32 1.0, %v734_v10  ;;  %s675_s24 = smov [#allocation11]  }
  0x1a   :  { %v115_v6 = vadd.f32 %v727_v4, %v101_v3  ;;  %v109_v11 = vadd.f32 1e-10, %v727_v4  ;;  %v738_v12 = vadd.f32 1e-10, %v732_v8  ;;  %v116_v21 = vadd.f32 %v732_v8, %v102_v15  ;;  %s418_s25 = sshll.u32 %s675_s24, 4  ;;  %s420_s28 = sshll.u32 %s905_s5, 4  ;;  %s419_s25 = int_to_ptr.vmem [resolvable:$true] %s418_s25  ;;  %s421_s28 = int_to_ptr.hbm [resolvable:$true] %s420_s28 }
  0x1b   :  { %454 = vlog2.f32 %v123_v9  ;;  %v751_v23 = vadd.f32 4.0, %v177_v14  ;;  %v757_v26 = vadd.f32 4.0, %v742_v16  ;;  %v124_v31 = vadd.f32 1e-10, %v102_v15 }
  0x1c   :  { %v117_v13 = vadd.f32 1e-10, %v115_v6  ;;  %456 = vlog2.f32 %v109_v11  ;;  %v149_v17 = vadd.f32 1.0, %v109_v11  ;;  %v153_v18 = vadd.f32 2.0, %v109_v11 }
  0x1d   :  { %v155_v19 = vadd.f32 3.0, %v109_v11  ;;  %458 = vlog2.f32 %v738_v12  ;;  %v745_v20 = vadd.f32 4.0, %v109_v11  ;;  %v749_v22 = vadd.f32 4.0, %v738_v12 }
  0x1e   :  { %460 = vlog2.f32 %v117_v13  ;;  %v150_v24 = vadd.f32 1.0, %v738_v12  ;;  %v154_v25 = vadd.f32 2.0, %v738_v12  ;;  %v151_v27 = vmul.f32 %v149_v17, %v109_v11 }
  0x1f   :  { %352 = vrot.lane.b32.xlu0 %v724_v1, %s673_s2  ;;  %462 = vlog2.f32 %v745_v20  ;;  %v156_v28 = vadd.f32 3.0, %v738_v12  ;;  %v157_v29 = vmul.f32 %v155_v19, %v153_v18  ;;  %v118_v33 = vadd.f32 1e-10, %v116_v21 }
  0x20   :  { %464 = vlog2.f32 %v749_v22  ;;  %v199_v35 = vadd.f32 1.0, %v177_v14  ;;  %v152_v38 = vmul.f32 %v150_v24, %v738_v12  ;;  %v432_v44 = vadd.f32 -0.5, %v745_v20 }
  0x21   :  { %v761_v30 = vpop.eup %454  ;;  %466 = vrcp.f32 %v745_v20  ;;  %v158_v39 = vmul.f32 %v156_v28, %v154_v25  ;;  %v159_v40 = vmul.f32 %v157_v29, %v151_v27  ;;  %v200_v47 = vadd.f32 1.0, %v742_v16 }
  0x22   :  { %v457_v32 = vpop.eup %456  ;;  %468 = vrcp.f32 %v749_v22  ;;  %v203_v48 = vadd.f32 2.0, %v177_v14  ;;  %v205_v49 = vadd.f32 3.0, %v177_v14  ;;  %v433_v52 = vadd.f32 -0.5, %v749_v22 }
  0x23   :  { %v459_v34 = vpop.eup %458  ;;  %470 = vrcp.f32 %v751_v23  ;;  %v160_v51 = vmul.f32 %v158_v39, %v152_v38  ;;  %v201_v53 = vmul.f32 %v199_v35, %v177_v14  ;;  %v204_v55 = vadd.f32 2.0, %v742_v16 }
  0x24   :  { %v461_v36 = vpop.eup %460  ;;  %472 = vrcp.f32 %v757_v26  ;;  %v206_v56 = vadd.f32 3.0, %v742_v16  ;;  %v783_v57 = vadd.f32 %v109_v11, %v730_v7  ;;  %v792_v61 = vadd.f32 %v738_v12, %v734_v10 }
  0x25   :  { %v463_v41 = vpop.eup %462  ;;  %474 = vlog2.f32 %v124_v31  ;;  %v796_v63 = vmul.f32 0.6931472, %v457_v32  ;;  %v202_v3 = vmul.f32 %v200_v47, %v742_v16  ;;  %v207_v5 = vmul.f32 %v205_v49, %v203_v48 }
  0x26   :  { %v465_v43 = vpop.eup %464  ;;  %476 = vlog2.f32 %v118_v33  ;;  %v132_v59 = vmul.f32 0.6931472, %v463_v41  ;;  %v806_v15 = vmul.f32 0.6931472, %v459_v34  ;;  %v808_v17 = vmul.f32 0.6931472, %v461_v36 }
  0x27   :  { %v770_v45 = vpop.eup %466  ;;  %478 = vlog2.f32 %v159_v40  ;;  %v134_v11 = vmul.f32 0.6931472, %v465_v43  ;;  %v811_v18 = vadd.f32 4.0, %v783_v57  ;;  %v208_v24 = vmul.f32 %v206_v56, %v204_v55 }
  0x28   :  { %v773_v50 = vpop.eup %468  ;;  %480 = vlog2.f32 %v751_v23  ;;  %v137_v60 = vmul.f32 %v770_v45, %v770_v45  ;;  %v813_v21 = vmul.f32 %v432_v44, %v132_v59  ;;  %v816_v25 = vadd.f32 4.0, %v792_v61 }
  0x29   :  { %v776_v54 = vpop.eup %470  ;;  %482 = vlog2.f32 %v757_v26  ;;  %v138_v2 = vmul.f32 %v773_v50, %v773_v50  ;;  %v209_v31 = vmul.f32 %v207_v5, %v201_v53  ;;  %v819_v33 = vmul.f32 %v433_v52, %v134_v11 }
  0x2a   :  { %v785_v58 = vpop.eup %472  ;;  %484 = vlog2.f32 %v160_v51  ;;  %v187_v13 = vmul.f32 %v776_v54, %v776_v54  ;;  %v139_v19 = vmul.f32 0.0007936508, %v137_v60  ;;  %v435_v38 = vadd.f32 -0.5, %v757_v26 }
  0x2b   :  { %v794_v62 = vpop.eup %474  ;;  %v188_v12 = vmul.f32 %v785_v58, %v785_v58  ;;  %v140_v29 = vmul.f32 0.0007936508, %v138_v2  ;;  %486 = vlog2.f32 %v811_v18  ;;  %v165_v44 = vsub.f32 %v813_v21, %v745_v20 }
  0x2c   :  { %v477_v6 = vpop.eup %476  ;;  %v189_v34 = vmul.f32 0.0007936508, %v187_v13  ;;  %488 = vlog2.f32 %v816_v25  ;;  %v141_v40 = vsub.f32 0.0027777778, %v139_v19  ;;  %v166_v48 = vsub.f32 %v819_v33, %v749_v22 }
  0x2d   :  { %v479_v16 = vpop.eup %478  ;;  %v190_v35 = vmul.f32 0.0007936508, %v188_v12  ;;  %v823_v36 = vmul.f32 0.6931472, %v477_v6  ;;  %490 = vrcp.f32 %v811_v18  ;;  %v142_v43 = vsub.f32 0.0027777778, %v140_v29 }
  0x2e   :  { %v481_v27 = vpop.eup %480  ;;  %v828_v41 = vmul.f32 0.6931472, %v479_v16  ;;  %492 = vrcp.f32 %v816_v25  ;;  %v191_v49 = vsub.f32 0.0027777778, %v189_v34  ;;  %v251_v55 = vadd.f32 1.0, %v783_v57 }
  0x2f   :  { %v483_v32 = vpop.eup %482  ;;  %v192_v51 = vsub.f32 0.0027777778, %v190_v35  ;;  %494 = vlog2.f32 %v209_v31  ;;  %v255_v56 = vadd.f32 2.0, %v783_v57  ;;  %v257_v59 = vadd.f32 3.0, %v783_v57 }
  0x30   :  { %v485_v39 = vpop.eup %484  ;;  %v184_v47 = vmul.f32 0.6931472, %v483_v32  ;;  %v143_v5 = vmul.f32 %v141_v40, %v137_v60  ;;  %v252_v20 = vadd.f32 1.0, %v792_v61  ;;  %v256_v6 = vadd.f32 2.0, %v792_v61 }
  0x31   :  { %v487_v52 = vpop.eup %486  ;;  %v835_v53 = vmul.f32 0.6931472, %v485_v39  ;;  %v258_v22 = vadd.f32 3.0, %v792_v61  ;;  %v144_v11 = vmul.f32 %v142_v43, %v138_v2  ;;  %v193_v21 = vmul.f32 %v191_v49, %v187_v13 }
  0x32   :  { %v214_v16 = vmul.f32 %v435_v38, %v184_v47  ;;  %v253_v29 = vmul.f32 %v251_v55, %v783_v57  ;;  %v259_v31 = vmul.f32 %v257_v59, %v255_v56  ;;  %v436_v32 = vadd.f32 -0.5, %v811_v18 }
  0x33   :  { %v145_v33 = vsub.f32 0.083333336, %v143_v5  ;;  %v254_v35 = vmul.f32 %v252_v20, %v792_v61  ;;  %v437_v39 = vadd.f32 -0.5, %v816_v25  ;;  %v146_v40 = vsub.f32 0.083333336, %v144_v11 }
  0x34   :  { %v216_v43 = vsub.f32 %v214_v16, %v757_v26  ;;  %v167_v55 = vadd.f32 0.9189385, %v165_v44  ;;  %v168_v56 = vadd.f32 0.9189385, %v166_v48  ;;  %v305_v20 = vsub.f32 %v796_v63, %v808_v17 }
  0x35   :  { %v306_v11 = vsub.f32 %v806_v15, %v823_v36  ;;  %vm325_vm0 = vcmp.lt.f32.partialorder %v730_v7, 1e-08  ;;  %vm326_vm1 = vcmp.lt.f32.partialorder %v734_v10, 1e-08 }
  0x36   :  { %v218_v48 = vadd.f32 0.9189385, %v216_v43  ;;  %v307_v16 = vmul.f32 %v305_v20, %v727_v4 }
  0x89   :  { %v351_v37 = vpop.permute.xlu0 %350 }
  0x8a   :  { %v356_v42 = vsub.f32 %v721_v0, %v351_v37  ;;  %v434_v37 = vadd.f32 -0.5, %v751_v23 }
  0x8c   :  { %v358_v46 = vand.u32 2147483647, %v356_v42  ;;  %v210_v42 = vmul.f32 %v208_v24, %v202_v3  ;;  %v489_v3 = vpop.eup %488  ;;  %v194_v24 = vmul.f32 %v192_v51, %v188_v12  ;;  %v261_v51 = vmul.f32 %v259_v31, %v253_v29 }
  0x8d   :  { %v236_v12 = vmul.f32 0.6931472, %v489_v3  ;;  %v309_v29 = vmul.f32 1.442695, %v307_v16 }
  0x8e   :  { %362 = vrot.lane.b32.xlu1 %v358_v46, %s674_s4  ;;  %v182_v46 = vmul.f32 0.6931472, %v481_v27  ;;  %496 = vlog2.f32 %v210_v42  ;;  %v234_v27 = vmul.f32 0.6931472, %v487_v52  ;;  %v195_v42 = vsub.f32 0.083333336, %v193_v21 }
  0x8f   :  { %v196_v47 = vsub.f32 0.083333336, %v194_v24  ;;  %v266_v5 = vmul.f32 %v437_v39, %v236_v12  ;;  %498 = vlog2.f32 %v261_v51  ;;  %v308_v21 = vmul.f32 %v306_v11, %v732_v8 }
  0x90   :  { %v265_v52 = vmul.f32 %v436_v32, %v234_v27  ;;  %v197_v26 = vmul.f32 %v776_v54, %v195_v42 }
  0x91   :  { %v353_v9 = vpop.permute.xlu0 %352  ;;  %v198_v44 = vmul.f32 %v785_v58, %v196_v47  ;;  %v268_v54 = vsub.f32 %v266_v5, %v816_v25  ;;  %v311_v31 = vmul.f32 1.442695, %v308_v21  ;;  %v295_v58 = vsub.f32 1.0, %v721_v0 }
  0x92   :  { %v357_v14 = vsub.f32 %v724_v1, %v353_v9  ;;  %v843_v9 = vpop.eup %490 }
  0x93   :  { %v845_v19 = vpop.eup %492  ;;  %v239_v60 = vmul.f32 %v843_v9, %v843_v9  ;;  %v220_v32 = vadd.f32 %v218_v48, %v198_v44  ;;  %v270_v12 = vadd.f32 0.9189385, %v268_v54  ;;  %v330_v54 = vmul.f32 %v724_v1, %v724_v1 }
  0x94   :  { %v359_v28 = vand.u32 2147483647, %v357_v14  ;;  %v213_v14 = vmul.f32 %v434_v37, %v182_v46  ;;  %v495_v2 = vpop.eup %494  ;;  %v260_v37 = vmul.f32 %v258_v22, %v256_v6  ;;  %v148_v6 = vmul.f32 %v773_v50, %v146_v40 }
  0x95   :  { %v241_v34 = vmul.f32 0.0007936508, %v239_v60  ;;  %v497_v46 = vpop.eup %496  ;;  %v222_v50 = vmul.f32 0.6931472, %v495_v2 }
  0x96   :  { %364 = vrot.lane.b32.xlu1 %v359_v28, %s674_s4  ;;  %v240_v28 = vmul.f32 %v845_v19, %v845_v19  ;;  %v215_v13 = vsub.f32 %v213_v14, %v751_v23  ;;  %v262_v59 = vmul.f32 %v260_v37, %v254_v35  ;;  %v147_v23 = vmul.f32 %v770_v45, %v145_v33  ;;  %v499_v2 = vpop.eup %498 }
  0x97   :  { %v243_v57 = vsub.f32 0.0027777778, %v241_v34  ;;  %v267_v14 = vsub.f32 %v265_v52, %v811_v18  ;;  %v296_v18 = vsub.f32 1.0, %v724_v1  ;;  %v224_v33 = vmul.f32 0.6931472, %v497_v46 }
  0x98   :  { %v242_v38 = vmul.f32 0.0007936508, %v240_v28  ;;  %v217_v22 = vadd.f32 0.9189385, %v215_v13  ;;  %500 = vlog2.f32 %v262_v59  ;;  %v169_v24 = vadd.f32 %v167_v55, %v147_v23 }
  0x99   :  { %v245_v61 = vmul.f32 %v243_v57, %v239_v60  ;;  %v170_v60 = vadd.f32 %v168_v56, %v148_v6  ;;  %v126_v34 = vmul.f32 0.6931472, %v761_v30  ;;  %v269_v37 = vadd.f32 0.9189385, %v267_v14 }
  0x9a   :  { %v244_v49 = vsub.f32 0.0027777778, %v242_v38  ;;  %502 = vpow2.f32 %v309_v29  ;;  %v128_v13 = vmul.f32 0.6931472, %v794_v62  ;;  %v175_v39 = vsub.f32 %v169_v24, %v828_v41 }
  0x9b   :  { %v247_v45 = vsub.f32 0.083333336, %v245_v61  ;;  %504 = vpow2.f32 %v311_v31  ;;  %v176_v40 = vsub.f32 %v170_v60, %v835_v53  ;;  %v281_v30 = vadd.f32 %v727_v4, %v730_v7 }
  0x9c   :  { %v246_v3 = vmul.f32 %v244_v49, %v240_v28  ;;  %v219_v28 = vadd.f32 %v217_v22, %v197_v26  ;;  %v226_v43 = vsub.f32 %v220_v32, %v224_v33  ;;  %v283_v62 = vsub.f32 %v808_v17, %v796_v63 }
  0x9d   :  { %v249_v35 = vmul.f32 %v843_v9, %v247_v45  ;;  %v282_v9 = vadd.f32 %v732_v8, %v734_v10  ;;  %v297_v57 = vadd.f32 1e-10, %v295_v58  ;;  %v274_v46 = vmul.f32 0.6931472, %v499_v2 }
  0x9e   :  { %v248_v27 = vsub.f32 0.083333336, %v246_v3  ;;  %v501_v38 = vpop.eup %500  ;;  %v225_v42 = vsub.f32 %v219_v28, %v222_v50  ;;  %v287_v47 = vsub.f32 %v796_v63, %v126_v34  ;;  %v298_v49 = vadd.f32 1e-10, %v296_v18 }
  0x9f   :  { %v276_v51 = vmul.f32 0.6931472, %v501_v38  ;;  %v284_v53 = vsub.f32 %v823_v36, %v806_v15  ;;  %v288_v4 = vsub.f32 %v806_v15, %v128_v13  ;;  %v228_v8 = vadd.f32 %v226_v43, %v176_v40  ;;  %v381_v38 = vld [vmem:[#allocation10] sm:$0xff] }
  0xa0   :  { %v250_v25 = vmul.f32 %v845_v19, %v248_v27  ;;  %v271_v19 = vadd.f32 %v269_v37, %v249_v35  ;;  %v503_v52 = vpop.eup %502  ;;  %v227_v55 = vadd.f32 %v225_v42, %v175_v39  ;;  %v285_v61 = vmul.f32 %v283_v62, %v281_v30  ;;  %v382_v39 = vld [vmem:[#allocation10 + $0x8] sm:$0xff] }
  0xa1   :  { %v505_v56 = vpop.eup %504  ;;  %506 = vlog2.f32 %v297_v57  ;;  %v313_v17 = vmul.f32 %v503_v52, %v295_v58  ;;  %v289_v23 = vmul.f32 %v287_v47, %v730_v7  ;;  %v286_v5 = vmul.f32 %v284_v53, %v282_v9 }
  0xa2   :  { %v272_v41 = vadd.f32 %v270_v12, %v250_v25  ;;  %v277_v59 = vsub.f32 %v271_v19, %v274_v46  ;;  %508 = vlog2.f32 %v298_v49  ;;  %v314_v63 = vmul.f32 %v505_v56, %v296_v18 }
  0xa3   :  { %v290_v20 = vmul.f32 %v288_v4, %v734_v10  ;;  %v315_v36 = vadd.f32 %v313_v17, %v721_v0  ;;  %v291_v22 = vadd.f32 %v289_v23, %v285_v61  ;;  %v329_v27 = vmul.f32 %v721_v0, %v721_v0 }
  0xa4   :  { %v278_v3 = vsub.f32 %v272_v41, %v276_v51  ;;  %v316_v15 = vadd.f32 %v314_v63, %v724_v1  ;;  %v279_v26 = vsub.f32 %v227_v55, %v277_v59  ;;  %v332_v34 = vmul.f32 0.1, %v330_v54 }
  0xa5   :  { %v317_v6 = vadd.f32 1e-10, %v315_v36  ;;  %v292_v14 = vadd.f32 %v290_v20, %v286_v5  ;;  %v331_v32 = vmul.f32 0.1, %v329_v27  ;;  %v383_v40 = vand.u32 2147483647, %v381_v38 }
  0xa6   :  { %v318_v11 = vadd.f32 1e-10, %v316_v15  ;;  %v280_v48 = vsub.f32 %v228_v8, %v278_v3  ;;  %v293_v16 = vadd.f32 %v291_v22, %v279_v26  ;;  %v384_v7 = vand.u32 2147483647, %v382_v39 }
  0xa7   :  { %v507_v44 = vpop.eup %506  ;;  %510 = vlog2.f32 %v317_v6  ;;  %v386_v42 = vsel %vm385_vm3, %v383_v40, 0.0  ;;  %v403_v6 = vlaneseq }
  0xa8   :  { %v509_v45 = vpop.eup %508  ;;  %512 = vlog2.f32 %v318_v11  ;;  %v300_v21 = vmul.f32 0.6931472, %v507_v44  ;;  %v294_v24 = vadd.f32 %v292_v14, %v280_v48  ;;  %v387_v30 = vsel %vm385_vm3, %v384_v7, 0.0 }
  0xa9   :  { %v302_v50 = vmul.f32 0.6931472, %v509_v45  ;;  %v388_v43 = vadd.f32 %v387_v30, %v386_v42  ;;  %v404_v26 = vshrl.u32 %v403_v6, 7  ;;  %v406_v22 = vand.u32 127, %v403_v6 }
  0xaa   :  { %v303_v29 = vsub.f32 %v293_v16, %v300_v21 }
  0xab   :  { %v304_v58 = vsub.f32 %v294_v24, %v302_v50  ;;  %389 = vadd.xlane.f32.xlu0 %v388_v43  ;;  %vm407_vm5 = vcmp.eq.s32.totalorder %v404_v26, 0  ;;  %vm408_vm6 = vcmp.eq.s32.totalorder %v406_v22, 0 }
  0xac   :  { %vm409_vm7 = vmand %vm407_vm5, %vm408_vm6 }
  0xad   :  { %v511_v60 = vpop.eup %510 }
  0xae   :  { %v513_v28 = vpop.eup %512  ;;  %v320_v31 = vmul.f32 0.6931472, %v511_v60 }
  0xaf   :  { %v322_v18 = vmul.f32 0.6931472, %v513_v28 }
  0xb0   :  { %v323_v33 = vsub.f32 0.0, %v320_v31 }
  0xb1   :  { %v324_v35 = vsub.f32 0.0, %v322_v18 }
  0xb2   :  { %v327_v37 = vsel %vm325_vm0, %v323_v33, %v303_v29 }
  0xb3   :  { %v328_v0 = vsel %vm326_vm1, %v324_v35, %v304_v58  ;;  %v333_v2 = vadd.f32 %v331_v32, %v327_v37 }
  0xb4   :  { %v334_v13 = vadd.f32 %v332_v34, %v328_v0 }
  0xb5   :  { %v336_v1 = vsel %vm335_vm2, %v333_v2, 0.0 }
  0xb6   :  { %v337_v25 = vsel %vm335_vm2, %v334_v13, 0.0 }
  0xb7   :  { %v338_v12 = vadd.f32 %v337_v25, %v336_v1 }
  0xb9   :  { %339 = vadd.xlane.f32.xlu2 %v338_v12 }
 0x100   :  { %v363_v10 = vpop.permute.xlu1 %362 }
 0x101   :  { %v369_v62 = vsel %vm368_vm4, %v363_v10, 0.0 }
 0x108   :  { %v365_v9 = vpop.permute.xlu1 %364 }
 0x109   :  { %v370_v57 = vsel %vm368_vm4, %v365_v9, 0.0 }
 0x10a   :  { %v371_v19 = vadd.f32 %v370_v57, %v369_v62 }
 0x10c   :  { %372 = vadd.xlane.f32.xlu2 %v371_v19 }
 0x11e   :  { %v390_v52 = vpop.xlane.xlu0 %389 }
 0x11f   :  { %v391_v55 = vrot.slane %v390_v52, 4 }
 0x121   :  { %v392_v56 = vadd.f32 %v391_v55, %v390_v52 }
 0x123   :  { %v393_v8 = vrot.slane %v392_v56, 2 }
 0x125   :  { %v394_v23 = vadd.f32 %v393_v8, %v392_v56 }
 0x127   :  { %v395_v5 = vrot.slane %v394_v23, 1 }
 0x129   :  { %v396_v15 = vadd.f32 %v395_v5, %v394_v23 }
 0x12c   :  { %v340_v46 = vpop.xlane.xlu2 %339 }
 0x12d   :  { %v341_v47 = vrot.slane %v340_v46, 4 }
 0x12f   :  { %v342_v49 = vadd.f32 %v341_v47, %v340_v46 }
 0x131   :  { %v343_v41 = vrot.slane %v342_v49, 2 }
 0x133   :  { %v344_v51 = vadd.f32 %v343_v41, %v342_v49 }
 0x135   :  { %v345_v53 = vrot.slane %v344_v51, 1 }
 0x137   :  { %v346_v4 = vadd.f32 %v345_v53, %v344_v51 }
 0x139   :  { %438 = vpush %v346_v4 }
 0x16a   :  { %s439_s17 = spop %438 }
 0x16b   :  { %s398_s18 = smul.f32 0.001953125, %s439_s17 }
 0x17f   :  { %v373_v61 = vpop.xlane.xlu2 %372 }
 0x180   :  { %v374_v17 = vrot.slane %v373_v61, 4 }
 0x182   :  { %v375_v59 = vadd.f32 %v374_v17, %v373_v61 }
 0x184   :  { %v376_v63 = vrot.slane %v375_v59, 2 }
 0x186   :  { %v377_v3 = vadd.f32 %v376_v63, %v375_v59 }
 0x188   :  { %v378_v20 = vrot.slane %v377_v3, 1 }
 0x18a   :  { %v379_v36 = vadd.f32 %v378_v20, %v377_v3 }
 0x18c   :  { %440 = vpush %v379_v36 }
 0x18d   :  { %442 = vpush %v396_v15 }
 0x1bd   :  { %s441_s19 = spop %440 }
 0x1be   :  { %s399_s20 = smul.f32 0.01, %s441_s19  ;;  %s443_s21 = spop %442 }
 0x1bf   :  { %s401_s23 = smul.f32 0.001, %s443_s21 }
 0x1c0   :  { %s400_s22 = sadd.f32 %s399_s20, %s398_s18 }
 0x1c2   :  { %s402_s29 = sadd.f32 %s401_s23, %s400_s22 }
 0x1c4   :  { %v410_v11 = vstv %s402_s29 }
 0x1c5   :  { %v411_v44 = vsel %vm409_vm7, %v410_v11, 0.0 }
 0x1c6   :  { %412 = vst [vmem:[#allocation11] sm:$0xff] %v411_v44 }
 0x1c7   :  { %423 = dma.vmem_to_hbm [thread:$0]  %s419_s25, 128, %s421_s28, [#allocation4]  }
 0x1c8   :  { %664 = dma.done.wait [#allocation4], 128  }
 0x1c9   :  { %665 = vsyncadd [#allocation4], 4294967168 }
 0x1ca   :  { %428 = vsyncpa [#allocation3], 1 }
 0x1cb   :  { %429 = vsyncpa [#allocation6], 1 }
 0x1cc   :  { %430 = vsyncpa [#allocation9], 1 }
 0x1cd   :  { %431 = vsyncpa [#allocation4], 1 }

</bundles_post_ra>
